<compile_context>
chip_gen: v7x
topology: tpu7x:2x2x1
jax: 0.10.0
libtpu: 0.0.40
codegen_flags: <defaults>
</compile_context>

<pallas_src>
import functools

import jax
import jax.numpy as jnp
from jax.experimental import pallas as pl
from jax.experimental.pallas import tpu as pltpu


def _round_up(x: int, m: int) -> int:
    return ((x + m - 1) // m) * m


# ----------------------------------------------------------------------------
# Encoder: fused [F, 4D] matmul + clamp(logstd) -> single [N, Wp] output slab
# ----------------------------------------------------------------------------
def _vgae_encode_kernel(x_ref, w_ref, y_ref, *, d_latent):
    # One MXU matmul for all four heads (+ lane padding columns).
    y = jnp.dot(x_ref[...], w_ref[...], preferred_element_type=jnp.float32)
    # clamp(max=10) applies only to the logstd head (columns [3D, 4D)); padded
    # columns (>= 4D) are zeros, so min(., 10) on them is a no-op.
    col = jax.lax.broadcasted_iota(jnp.int32, y.shape, 1)
    y_ref[...] = jnp.where(col >= 3 * d_latent, jnp.minimum(y, 10.0), y)


def vgae_encode(x, w_mu1, w_mu2, w_mu3, w_logstd, *, tile_n=128):
    """Returns (z [N, 3D], logstd [N, D]).  In eval mode mu_i == z[:, i*D:(i+1)*D]."""
    N, F = x.shape
    D = w_mu1.shape[1]

    # Fuse the four encoder heads into one weight matrix.
    w_cat = jnp.concatenate([w_mu1, w_mu2, w_mu3, w_logstd], axis=1)  # [F, 4D]

    # Pad: rows of x to the tile size, contraction dim F to a sublane multiple,
    # fused output width to a lane multiple (unmasked, lane-dense stores).
    Np = _round_up(N, tile_n)
    Fp = _round_up(F, 8)
    Wp = _round_up(4 * D, 128)
    if (Np, Fp) != (N, F):
        x = jnp.pad(x, ((0, Np - N), (0, Fp - F)))
    if (Fp, Wp) != (F, 4 * D):
        w_cat = jnp.pad(w_cat, ((0, Fp - F), (0, Wp - 4 * D)))

    grid = (Np // tile_n,)
    y = pl.pallas_call(
        functools.partial(_vgae_encode_kernel, d_latent=D),
        grid=grid,
        in_specs=[pl.BlockSpec((tile_n, Fp), lambda i: (i, 0)),
                  pl.BlockSpec((Fp, Wp), lambda i: (0, 0))],
        out_specs=pl.BlockSpec((tile_n, Wp), lambda i: (i, 0)),
        out_shape=jax.ShapeDtypeStruct((Np, Wp), jnp.float32),
        compiler_params=pltpu.CompilerParams(
            dimension_semantics=("parallel",),
            vmem_limit_bytes=64 * 1024 * 1024),
        cost_estimate=pl.CostEstimate(
            flops=2 * Np * Fp * Wp,
            transcendentals=0,
            bytes_accessed=4 * (Np * Fp + Fp * Wp + Np * Wp)),
    )(x, w_cat)

    y = y[:N]
    z = y[:, : 3 * D]
    logstd = y[:, 3 * D: 4 * D]
    return z, logstd


# ----------------------------------------------------------------------------
# InnerProductDecoder.forward_all:  sigmoid(Z @ Z.T)  — 2-D tiled Pallas kernel
# ----------------------------------------------------------------------------
def _inner_product_decoder_kernel(zr_ref, zc_ref, adj_ref):
    # Contract the last dims of both operands (MXU transposed-RHS path; no .T).
    logits = jax.lax.dot_general(
        zr_ref[...], zc_ref[...],
        dimension_numbers=(((1,), (1,)), ((), ())),
        preferred_element_type=jnp.float32)
    adj_ref[...] = jax.nn.sigmoid(logits).astype(adj_ref.dtype)


def decode_all(z, *, tile_n=128, out_dtype=jnp.float32):
    """Dense adjacency sigmoid(z @ z.T) -> [N, N] in out_dtype."""
    N, D3 = z.shape
    Np = _round_up(N, tile_n)
    D3p = _round_up(D3, 128)  # lane-align contraction dim; zero pad is exact.
    if (Np, D3p) != (N, D3):
        z = jnp.pad(z, ((0, Np - N), (0, D3p - D3)))

    grid = (Np // tile_n, Np // tile_n)
    out_bytes = jnp.dtype(out_dtype).itemsize
    cost = pl.CostEstimate(
        flops=2 * Np * Np * D3p,
        transcendentals=Np * Np,                       # sigmoid -> exp
        bytes_accessed=Np * Np * out_bytes + 2 * Np * D3p * 4)

    adj = pl.pallas_call(
        _inner_product_decoder_kernel,
        grid=grid,
        in_specs=[pl.BlockSpec((tile_n, D3p), lambda i, j: (i, 0)),
                  pl.BlockSpec((tile_n, D3p), lambda i, j: (j, 0))],
        out_specs=pl.BlockSpec((tile_n, tile_n), lambda i, j: (i, j)),
        out_shape=jax.ShapeDtypeStruct((Np, Np), out_dtype),
        compiler_params=pltpu.CompilerParams(
            dimension_semantics=("parallel", "parallel"),
            vmem_limit_bytes=64 * 1024 * 1024),
        cost_estimate=cost,
    )(z, z)
    return adj[:N, :N]


# ----------------------------------------------------------------------------
# VGAE forward (eval mode) and kl_loss glue
# ----------------------------------------------------------------------------
def vgae_forward(x, w_mu1, w_mu2, w_mu3, w_logstd, *, tile_n=128):
    """Returns (z, mu1, mu2, mu3, logstd).  mu_i are views of z (eval mode)."""
    D = w_mu1.shape[1]
    z, logstd = vgae_encode(x, w_mu1, w_mu2, w_mu3, w_logstd, tile_n=tile_n)
    mu1 = z[:, 0 * D:1 * D]
    mu2 = z[:, 1 * D:2 * D]
    mu3 = z[:, 2 * D:3 * D]
    return z, mu1, mu2, mu3, logstd


def kl_loss(mu1, mu2, mu3, logstd):
    def term(mu):
        return -0.5 * jnp.mean(
            jnp.sum(1.0 + 2.0 * logstd - mu ** 2 - jnp.exp(logstd) ** 2, axis=1))
    return term(mu1) + term(mu2) + term(mu3)


if __name__ == "__main__":
    # Small shapes: N=16 nodes, F=32 input features, D=16 latent dim per head.
    N, F, D = 16, 32, 16

    key = jax.random.PRNGKey(0)
    kx, k1, k2, k3, k4 = jax.random.split(key, 5)

    x = jax.random.normal(kx, (N, F), dtype=jnp.float32)
    scale = 1.0 / jnp.sqrt(jnp.float32(F))
    w_mu1 = jax.random.normal(k1, (F, D), dtype=jnp.float32) * scale
    w_mu2 = jax.random.normal(k2, (F, D), dtype=jnp.float32) * scale
    w_mu3 = jax.random.normal(k3, (F, D), dtype=jnp.float32) * scale
    w_logstd = jax.random.normal(k4, (F, D), dtype=jnp.float32) * scale

    z, mu1, mu2, mu3, logstd = vgae_forward(x, w_mu1, w_mu2, w_mu3, w_logstd)
    adj = decode_all(z)            # f32; pass out_dtype=jnp.bfloat16 to halve writeback
    kl = kl_loss(mu1, mu2, mu3, logstd)

    jax.block_until_ready((z, adj, kl))

    # Lightweight correctness check against plain-JAX reference.
    mu1_r = x @ w_mu1
    mu2_r = x @ w_mu2
    mu3_r = x @ w_mu3
    logstd_r = jnp.minimum(x @ w_logstd, 10.0)
    z_r = jnp.concatenate([mu1_r, mu2_r, mu3_r], axis=-1)
    adj_r = jax.nn.sigmoid(z_r @ z_r.T)
    assert jnp.allclose(z, z_r, atol=1e-5, rtol=1e-5)
    assert jnp.allclose(mu1, mu1_r, atol=1e-5, rtol=1e-5)
    assert jnp.allclose(logstd, logstd_r, atol=1e-5, rtol=1e-5)
    assert jnp.allclose(adj, adj_r, atol=1e-5, rtol=1e-5)

    print("KERNEL_OK")
</pallas_src>

<mosaic_0001>
module attributes {stable_mosaic.version = 11 : i64} {
  func.func @_vgae_encode_kernel(%arg0: i32, %arg1: memref<128x32xf32, #tpu.memory_space<vmem>>, %arg2: memref<32x128xf32, #tpu.memory_space<vmem>>, %arg3: memref<128x128xf32, #tpu.memory_space<vmem>>) attributes {dimension_semantics = [#tpu.dimension_semantics<parallel>], iteration_bounds = array<i64: 1>, scalar_prefetch = 0 : i64, scratch_operands = 0 : i64, tpu.core_type = #tpu.core_type<tc>, window_params = [{transform_indices = @transform_0, window_bounds = array<i64: 128, 32>}, {pipeline_mode = #tpu.pipeline_mode<synchronous>, transform_indices = @transform_1, window_bounds = array<i64: 32, 128>}, {transform_indices = @transform_2, window_bounds = array<i64: 128, 128>}]} {
    %c0 = arith.constant 0 : index
    %c0_0 = arith.constant 0 : index
    %0 = vector.load %arg1[%c0, %c0_0] : memref<128x32xf32, #tpu.memory_space<vmem>>, vector<128x32xf32>
    %c0_1 = arith.constant 0 : index
    %c0_2 = arith.constant 0 : index
    %1 = vector.load %arg2[%c0_1, %c0_2] : memref<32x128xf32, #tpu.memory_space<vmem>>, vector<32x128xf32>
    %cst = arith.constant dense<0.000000e+00> : vector<128x128xf32>
    %2 = tpu.matmul %0, %1, %cst {dimension_numbers = #tpu.dot_dimension_numbers<[1], [0], [0], [1], [0, 0, 1, 1], [], []>} : vector<128x32xf32>, vector<32x128xf32>, vector<128x128xf32> -> vector<128x128xf32>
    %3 = tpu.iota {dimensions = array<i32: 1>} : vector<128x128xi32>
    %c48_i32 = arith.constant 48 : i32
    %4 = vector.broadcast %c48_i32 : i32 to vector<128x128xi32>
    %5 = arith.cmpi sge, %3, %4 : vector<128x128xi32>
    %cst_3 = arith.constant 1.000000e+01 : f32
    %6 = vector.broadcast %cst_3 : f32 to vector<128x128xf32>
    %7 = arith.minimumf %2, %6 : vector<128x128xf32>
    %8 = arith.select %5, %7, %2 : vector<128x128xi1>, vector<128x128xf32>
    %c0_4 = arith.constant 0 : index
    %c0_5 = arith.constant 0 : index
    %9 = vector.load %arg3[%c0_4, %c0_5] : memref<128x128xf32, #tpu.memory_space<vmem>>, vector<128x128xf32>
    tpu.vector_store %arg3[%c0_4, %c0_5], %8 {strides = array<i32>} : memref<128x128xf32, #tpu.memory_space<vmem>>, vector<128x128xf32>,
    return
  }
  func.func @transform_0(%arg0: i32) -> (i32, i32) {
    %c0_i32 = arith.constant 0 : i32
    %c0_i32_0 = arith.constant 0 : i32
    return %arg0, %c0_i32 : i32, i32
  }
  func.func @transform_1(%arg0: i32) -> (i32, i32) {
    %c0_i32 = arith.constant 0 : i32
    %c0_i32_0 = arith.constant 0 : i32
    %c0_i32_1 = arith.constant 0 : i32
    return %c0_i32, %c0_i32_0 : i32, i32
  }
  func.func @transform_2(%arg0: i32) -> (i32, i32) {
    %c0_i32 = arith.constant 0 : i32
    %c0_i32_0 = arith.constant 0 : i32
    return %arg0, %c0_i32 : i32, i32
  }
}

</mosaic_0001>

<bundles_post_ra>
// kernel: tpu_custom_call.1
= control target key start
LH: loop header
LB: loop body
LE: loop exit
PB: predicated region body
PF: predicated region fallthrough
CT: control target
= control target key end

     0   :  { %7 = vsyncpa [#allocation3], 0  ;;  %s596_s0 = inlined_call_operand.hbm [shape: f32[128,32], index: 0, kind: input, shape index: {}]   ;;  %s597_s1 = inlined_call_operand.hbm [shape: f32[32,128], index: 1, kind: input, shape index: {}]   ;;  %s598_s2 = inlined_call_operand.hbm [shape: f32[128,128], index: 2, kind: output, shape index: {}]  }
   0x1   :  { %8 = vsyncpa [#allocation6], 0 }
   0x2   :  { %9 = vsyncpa [#allocation4], 0  ;;  %s480_s9 = smov [#allocation2]   ;;  %s408_s13 = scalar_lea.hbm %s596_s0, 2048 }
   0x3   :  { %s15_s10 = sshll.u32 %s480_s9, 4  ;;  %p409_p0 = scmp.ne.s32.totalorder %s596_s0, %s408_s13  ;;  %s16_s10 = int_to_ptr.vmem [resolvable:$true] %s15_s10 }
   0x4   :  { %p412_p1 = scmp.lt.u32.totalorder %s408_s13, %s596_s0 }
   0x6   :  { %p414_p2 = pnand %p412_p1, %p409_p0 }
   0x8   :  { %417 = shalt.err (!%p414_p2)
}
   0x9   :  { %s418_s18 = scalar_lea.vmem %s16_s10, 2048  ;;  %p423_p4 = scmp.lt.s32.totalorder %s16_s10, %s16_s10 }
   0xa   :  { %p419_p3 = scmp.ne.s32.totalorder %s16_s10, %s418_s18  ;;  %p424_p5 = scmp.lt.s32.totalorder %s418_s18, %s418_s18 }
   0xc   :  { %p425_p6 = por %p424_p5, %p423_p4 }
   0xe   :  { %p426_p7 = pnand %p425_p6, %p419_p3 }
  0x10   :  { %429 = shalt.err (!%p426_p7)
}
  0x11   :  { %s481_s19 = smov 128   ;;  %s482_s20 = smov 8  }
  0x12   :  { %21 = dma.hbm_to_vmem [thread:$0]  %s596_s0, 2048, %s16_s10, [#allocation3], %s481_s19, %s481_s19, %s482_s20  }
  0x13   :  { %s483_s23 = smov [#allocation5]   ;;  %s430_s27 = scalar_lea.hbm %s597_s1, 512 }
  0x14   :  { %s27_s24 = sshll.u32 %s483_s23, 4  ;;  %p431_p8 = scmp.ne.s32.totalorder %s597_s1, %s430_s27  ;;  %s28_s24 = int_to_ptr.vmem [resolvable:$true] %s27_s24 }
  0x15   :  { %p434_p9 = scmp.lt.u32.totalorder %s430_s27, %s597_s1 }
  0x17   :  { %p436_p10 = pnand %p434_p9, %p431_p8 }
  0x19   :  { %439 = shalt.err (!%p436_p10)
}
  0x1a   :  { %s440_s4 = scalar_lea.vmem %s28_s24, 512  ;;  %p445_p12 = scmp.lt.s32.totalorder %s28_s24, %s28_s24 }
  0x1b   :  { %p441_p11 = scmp.ne.s32.totalorder %s28_s24, %s440_s4  ;;  %p446_p13 = scmp.lt.s32.totalorder %s440_s4, %s440_s4 }
  0x1d   :  { %p447_p0 = por %p446_p13, %p445_p12 }
  0x1f   :  { %p448_p1 = pnand %p447_p0, %p441_p11 }
  0x21   :  { %451 = shalt.err (!%p448_p1)
}
  0x22   :  { %33 = dma.hbm_to_vmem [thread:$0]  %s597_s1, 512, %s28_s24, [#allocation6], %s481_s19, %s481_s19, %s482_s20  }
  0x23   :  { %474 = dma.done.wait [#allocation3], 2048  }
  0x24   :  { %475 = vsyncadd [#allocation3], 4294965248 }
  0x25   :  { %476 = dma.done.wait [#allocation6], 512  }
  0x26   :  { %477 = vsyncadd [#allocation6], 4294966784  ;;  %vm60_vm0 = vcmask 261120   ;;  %v56_v0 = vld [vmem:[#allocation5] sm:$0xff]  ;;  %v57_v1 = vld [vmem:[#allocation5 + $0x8] sm:$0xff]  ;;  %v254_v22 = vlaneseq  ;;  %s484_s1 = smov [#allocation7]  }
  0x27   :  { %v58_v2 = vld [vmem:[#allocation5 + $0x10] sm:$0xff]  ;;  %v391_v3 = vpack.c.bf16 %v57_v1, %v56_v0  ;;  %v59_v4 = vld [vmem:[#allocation5 + $0x18] sm:$0xff]  ;;  %v40_v5 = vld [vmem:[#allocation2] sm:$0xff]  ;;  %s310_s6 = sshll.u32 %s484_s1, 4  ;;  %s311_s6 = int_to_ptr.vmem [resolvable:$true] %s310_s6 }
  0x28   :  { %v48_v6 = vld [vmem:[#allocation2 + $0x40] sm:$0xff]  ;;  %v395_v7 = vpack.c.bf16 %v59_v4, %v58_v2  ;;  %367 = vmatprep.mubr.msk.f32.mxu0 %vm60_vm0, %v40_v5  ;;  %v41_v8 = vld [vmem:[#allocation2 + $0x8] sm:$0xff]  ;;  %v42_v10 = vld [vmem:[#allocation2 + $0x10] sm:$0xff]  ;;  %v546_v23 = vand.u32 127, %v254_v22  ;;  %s452_s7 = scalar_lea.vmem %s311_s6, 2048  ;;  %p457_p3 = scmp.lt.s32.totalorder %s311_s6, %s311_s6 }
  0x29   :  { %379 = vmatprep.mubr.msk.f32.mxu1 %vm60_vm0, %v48_v6  ;;  %392 = vmatprep.subr.bf16.mxu0 %v391_v3  ;;  %v49_v9 = vld [vmem:[#allocation2 + $0x48] sm:$0xff]  ;;  %v50_v11 = vld [vmem:[#allocation2 + $0x50] sm:$0xff]  ;;  %v43_v12 = vld [vmem:[#allocation2 + $0x18] sm:$0xff]  ;;  %p453_p2 = scmp.ne.s32.totalorder %s311_s6, %s452_s7  ;;  %p458_p4 = scmp.lt.s32.totalorder %s452_s7, %s452_s7 }
  0x2a   :  { %399 = vmatprep.subr.bf16.mxu1 %v391_v3  ;;  %394 = vmatpush3.bf16.msra.mxu0 %v391_v3  ;;  %v51_v13 = vld [vmem:[#allocation2 + $0x58] sm:$0xff]  ;;  %v44_v14 = vld [vmem:[#allocation2 + $0x20] sm:$0xff]  ;;  %v45_v16 = vld [vmem:[#allocation2 + $0x28] sm:$0xff]  ;;  %vm256_vm1 = vcmp.ge.s32.totalorder %v546_v23, 48 }
  0x2b   :  { %401 = vmatpush3.bf16.msra.mxu1 %v391_v3  ;;  %396 = vmatprep.subr.bf16.mxu0 %v395_v7  ;;  %v52_v15 = vld [vmem:[#allocation2 + $0x60] sm:$0xff]  ;;  %v53_v17 = vld [vmem:[#allocation2 + $0x68] sm:$0xff]  ;;  %v46_v18 = vld [vmem:[#allocation2 + $0x30] sm:$0xff]  ;;  %p459_p5 = por %p458_p4, %p457_p3 }
  0x2c   :  { %400 = vmatprep.subr.bf16.mxu1 %v395_v7  ;;  %v54_v19 = vld [vmem:[#allocation2 + $0x70] sm:$0xff]  ;;  %v47_v20 = vld [vmem:[#allocation2 + $0x38] sm:$0xff] }
  0x2d   :  { %v55_v21 = vld [vmem:[#allocation2 + $0x78] sm:$0xff]  ;;  %p460_p6 = pnand %p459_p5, %p453_p2 }
  0x2e   :  { %398 = vmatpush3.bf16.msra.mxu0 %v395_v7 }
  0x2f   :  { %402 = vmatpush3.bf16.msra.mxu1 %v395_v7 }
  0x31   :  { %368 = vmatmul.mubr.msk.f32.vlgmr.msra.gmra.mrb[0].mxu0 %vm60_vm0, %v41_v8 }
  0x32   :  { %380 = vmatmul.mubr.msk.f32.vlgmr.msra.gmra.mrb[0].mxu1 %vm60_vm0, %v49_v9  ;;  %370 = vmatprep.mubr.msk.f32.mxu0 %vm60_vm0, %v42_v10 }
  0x33   :  { %382 = vmatprep.mubr.msk.f32.mxu1 %vm60_vm0, %v50_v11 }
  0x35   :  { %371 = vmatmul.mubr.msk.f32.gmra.mrb[2].mxu0 %vm60_vm0, %v43_v12 }
  0x36   :  { %383 = vmatmul.mubr.msk.f32.gmra.mrb[2].mxu1 %vm60_vm0, %v51_v13  ;;  %373 = vmatprep.mubr.msk.f32.mxu0 %vm60_vm0, %v44_v14 }
  0x37   :  { %385 = vmatprep.mubr.msk.f32.mxu1 %vm60_vm0, %v52_v15 }
  0x39   :  { %374 = vmatmul.mubr.msk.f32.gmra.mrb[4].mxu0 %vm60_vm0, %v45_v16 }
  0x3a   :  { %386 = vmatmul.mubr.msk.f32.gmra.mrb[4].mxu1 %vm60_vm0, %v53_v17  ;;  %376 = vmatprep.mubr.msk.f32.mxu0 %vm60_vm0, %v46_v18 }
  0x3b   :  { %388 = vmatprep.mubr.msk.f32.mxu1 %vm60_vm0, %v54_v19 }
  0x3d   :  { %377 = vmatmul.mubr.msk.f32.gmra.mrb[6].mxu0 %vm60_vm0, %v47_v20 }
  0x3e   :  { %389 = vmatmul.mubr.msk.f32.gmra.mrb[6].mxu1 %vm60_vm0, %v55_v21 }
 0x104   :  { %v369_v24 = vpop.f32.mrb[0].mxu0 }
 0x105   :  { %v381_v25 = vpop.f32.mrb[0].mxu1  ;;  %v258_v26 = vmin.f32 %v369_v24, 10.0  ;;  %v175_v28 = vpop.f32.mrb[1].mxu0 }
 0x106   :  { %v266_v27 = vmin.f32 %v381_v25, 10.0  ;;  %v215_v29 = vpop.f32.mrb[1].mxu1  ;;  %v257_v30 = vmin.f32 %v175_v28, 10.0 }
 0x107   :  { %v265_v31 = vmin.f32 %v215_v29, 10.0  ;;  %v274_v32 = vsel %vm256_vm1, %v258_v26, %v369_v24 }
 0x108   :  { %v282_v33 = vsel %vm256_vm1, %v266_v27, %v381_v25  ;;  %290 = vst [vmem:[#allocation7 + $0x8] sm:$0xff] %v274_v32  ;;  %v273_v34 = vsel %vm256_vm1, %v257_v30, %v175_v28  ;;  %v372_v36 = vpop.f32.mrb[2].mxu0 }
 0x109   :  { %298 = vst [vmem:[#allocation7 + $0x48] sm:$0xff] %v282_v33  ;;  %v281_v35 = vsel %vm256_vm1, %v265_v31, %v215_v29  ;;  %v384_v37 = vpop.f32.mrb[2].mxu1  ;;  %289 = vst [vmem:[#allocation7] sm:$0xff] %v273_v34  ;;  %v260_v38 = vmin.f32 %v372_v36, 10.0  ;;  %v185_v40 = vpop.f32.mrb[3].mxu0 }
 0x10a   :  { %297 = vst [vmem:[#allocation7 + $0x40] sm:$0xff] %v281_v35  ;;  %v268_v39 = vmin.f32 %v384_v37, 10.0  ;;  %v225_v41 = vpop.f32.mrb[3].mxu1  ;;  %v259_v42 = vmin.f32 %v185_v40, 10.0 }
 0x10b   :  { %v267_v43 = vmin.f32 %v225_v41, 10.0  ;;  %v276_v44 = vsel %vm256_vm1, %v260_v38, %v372_v36 }
 0x10c   :  { %v284_v45 = vsel %vm256_vm1, %v268_v39, %v384_v37  ;;  %292 = vst [vmem:[#allocation7 + $0x18] sm:$0xff] %v276_v44  ;;  %v275_v46 = vsel %vm256_vm1, %v259_v42, %v185_v40  ;;  %v375_v48 = vpop.f32.mrb[4].mxu0 }
 0x10d   :  { %300 = vst [vmem:[#allocation7 + $0x58] sm:$0xff] %v284_v45  ;;  %v283_v47 = vsel %vm256_vm1, %v267_v43, %v225_v41  ;;  %v387_v49 = vpop.f32.mrb[4].mxu1  ;;  %291 = vst [vmem:[#allocation7 + $0x10] sm:$0xff] %v275_v46  ;;  %v262_v50 = vmin.f32 %v375_v48, 10.0  ;;  %v195_v52 = vpop.f32.mrb[5].mxu0 }
 0x10e   :  { %299 = vst [vmem:[#allocation7 + $0x50] sm:$0xff] %v283_v47  ;;  %v270_v51 = vmin.f32 %v387_v49, 10.0  ;;  %v235_v53 = vpop.f32.mrb[5].mxu1  ;;  %v261_v54 = vmin.f32 %v195_v52, 10.0 }
 0x10f   :  { %v269_v55 = vmin.f32 %v235_v53, 10.0  ;;  %v278_v56 = vsel %vm256_vm1, %v262_v50, %v375_v48 }
 0x110   :  { %v286_v57 = vsel %vm256_vm1, %v270_v51, %v387_v49  ;;  %294 = vst [vmem:[#allocation7 + $0x28] sm:$0xff] %v278_v56  ;;  %v277_v58 = vsel %vm256_vm1, %v261_v54, %v195_v52  ;;  %v378_v60 = vpop.f32.mrb[6].mxu0 }
 0x111   :  { %302 = vst [vmem:[#allocation7 + $0x68] sm:$0xff] %v286_v57  ;;  %v285_v59 = vsel %vm256_vm1, %v269_v55, %v235_v53  ;;  %v390_v61 = vpop.f32.mrb[6].mxu1  ;;  %293 = vst [vmem:[#allocation7 + $0x20] sm:$0xff] %v277_v58  ;;  %v264_v62 = vmin.f32 %v378_v60, 10.0  ;;  %v205_v0 = vpop.f32.mrb[7].mxu0 }
 0x112   :  { %301 = vst [vmem:[#allocation7 + $0x60] sm:$0xff] %v285_v59  ;;  %v272_v63 = vmin.f32 %v390_v61, 10.0  ;;  %v245_v1 = vpop.f32.mrb[7].mxu1  ;;  %v263_v2 = vmin.f32 %v205_v0, 10.0 }
 0x113   :  { %v271_v3 = vmin.f32 %v245_v1, 10.0  ;;  %v280_v4 = vsel %vm256_vm1, %v264_v62, %v378_v60 }
 0x114   :  { %v288_v5 = vsel %vm256_vm1, %v272_v63, %v390_v61  ;;  %296 = vst [vmem:[#allocation7 + $0x38] sm:$0xff] %v280_v4  ;;  %v279_v6 = vsel %vm256_vm1, %v263_v2, %v205_v0 }
 0x115   :  { %304 = vst [vmem:[#allocation7 + $0x78] sm:$0xff] %v288_v5  ;;  %v287_v7 = vsel %vm256_vm1, %v271_v3, %v245_v1  ;;  %295 = vst [vmem:[#allocation7 + $0x30] sm:$0xff] %v279_v6 }
 0x116   :  { %303 = vst [vmem:[#allocation7 + $0x70] sm:$0xff] %v287_v7 }
 0x117   :  { %463 = shalt.err (!%p460_p6)
}
 0x118   :  { %s464_s10 = scalar_lea.hbm %s598_s2, 2048 }
 0x119   :  { %p465_p7 = scmp.ne.s32.totalorder %s598_s2, %s464_s10  ;;  %p468_p8 = scmp.lt.u32.totalorder %s464_s10, %s598_s2 }
 0x11b   :  { %p470_p9 = pnand %p468_p8, %p465_p7 }
 0x11d   :  { %473 = shalt.err (!%p470_p9)
}
 0x11e   :  { %316 = dma.vmem_to_hbm [thread:$0]  %s311_s6, 2048, %s598_s2, [#allocation4], %s481_s19, %s481_s19, %s482_s20  }
 0x11f   :  { %478 = dma.done.wait [#allocation4], 2048  }
 0x120   :  { %479 = vsyncadd [#allocation4], 4294965248 }
 0x121   :  { %320 = vsyncpa [#allocation3], 1 }
 0x122   :  { %321 = vsyncpa [#allocation6], 1 }
 0x123   :  { %322 = vsyncpa [#allocation4], 1 }

</bundles_post_ra>
